<compile_context>
chip_gen: v7x
topology: tpu7x:2x2x1
jax: 0.10.0
libtpu: 0.0.40
codegen_flags: <defaults>
</compile_context>

<pallas_src>
import math

import jax
import jax.numpy as jnp
from jax.experimental import pallas as pl
from jax.experimental.pallas import tpu as pltpu

# ---------------- config (small shapes consistent with the module) ----------------
B = 2
N_POINTS = 15                      # input signal length
HOP = 1
F_BINS = N_POINTS + 1              # 16  (freq rows of the spectrogram)
T_BINS = N_POINTS // HOP + 1       # 16  (time cols of the spectrogram)
SIZE = (F_BINS, T_BINS)            # "size" of the spectrogram image
D_IN = F_BINS * T_BINS             # 256 -> fc1 input (lane-dense: 2 x 128)
HIDDEN = 128                       # fc1 output size (hard-coded 128 in MlpNet)
N_CLASSES = 10

VMEM = pltpu.MemorySpace.VMEM


# ---------------- fused Pallas kernel ----------------
def mlpnet_kernel(x_ref, basis_ref, w1_ref, b1_ref, w2_ref, b2_ref,
                  s_ref, logits_ref):
    """Fused forward.

    x:      (B, N)        raw signals
    basis:  (N, 2*D)      mean-centered fused window*DFT basis, cols [cos | sin],
                          column order d = f*T + t (PyTorch .view flatten order)
    w1:     (HIDDEN, D)   fc1.weight  (native PyTorch (out, in) orientation)
    b1:     (1, HIDDEN)
    w2:     (C, HIDDEN)   fc2.weight
    b2:     (1, C)
    s:      (B, D)        power spectrogram, flattened in PyTorch .view() order
    logits: (B, C)
    """
    x = x_ref[...]

    # Spectrogram: one MXU matmul for all (freq, time) bins, cos & sin halves
    # together.  Mean removal is pre-folded into the basis (wrapper), so no
    # in-kernel reduction is needed.
    proj = jnp.dot(x, basis_ref[...], preferred_element_type=jnp.float32)  # (B, 2D)
    d = s_ref.shape[1]
    real = proj[:, :d]                   # slices at 128-lane multiples -> free views
    imag = proj[:, d:]
    power = real * real + imag * imag    # (B, D) lane-dense
    s_ref[...] = power

    # fc1 + ReLU + fc2, contracting last dims (== x @ W^T, PyTorch Linear).
    h = jax.lax.dot_general(power, w1_ref[...],
                            dimension_numbers=(((1,), (1,)), ((), ())),
                            preferred_element_type=jnp.float32) + b1_ref[...]
    h = jnp.maximum(h, 0.0)
    logits_ref[...] = jax.lax.dot_general(h, w2_ref[...],
                                          dimension_numbers=(((1,), (1,)), ((), ())),
                                          preferred_element_type=jnp.float32) + b2_ref[...]


# ---------------- wrapper ----------------
def _spectrogram_basis(lambd):
    """Mean-centered fused Gaussian-window x DFT basis, shape (N, 2*F*T).

    Column d = f*T_BINS + t (cos block) / D + f*T_BINS + t (sin block), so the
    kernel's matmul output is already in PyTorch s.view(-1, F*T) flatten order.
    The per-signal mean removal (x - mean(x)) is folded in by centering each
    basis column over the signal axis:  (x - m·1) @ B == x @ (B - 1·colmean(B)).
    Depends on the learnable |lambd|, so it is recomputed per forward (tiny,
    (15, 512) = 30 KiB of glue in the wrapper).
    """
    n = jnp.arange(N_POINTS, dtype=jnp.float32)
    t = jnp.arange(T_BINS, dtype=jnp.float32) * float(HOP)
    f = jnp.arange(F_BINS, dtype=jnp.float32)
    lam = jnp.abs(lambd)
    g_nt = jnp.exp(-0.5 * jnp.square((n[:, None] - t[None, :]) / lam))       # (N, T)
    ang = 2.0 * jnp.pi * n[:, None] * f[None, :] / float(N_POINTS)           # (N, F)
    mc = (jnp.cos(ang)[:, :, None] * g_nt[:, None, :]).reshape(N_POINTS, D_IN)
    ms = (jnp.sin(ang)[:, :, None] * g_nt[:, None, :]).reshape(N_POINTS, D_IN)
    basis = jnp.concatenate([mc, ms], axis=1)                                # (N, 2D)
    return basis - jnp.mean(basis, axis=0, keepdims=True)                    # fold x-mean(x)


def mlpnet_forward(x, params):
    bb = x.shape[0]
    basis = _spectrogram_basis(params["lambd"])
    s_flat, logits = pl.pallas_call(
        mlpnet_kernel,
        out_shape=(jax.ShapeDtypeStruct((bb, D_IN), jnp.float32),
                   jax.ShapeDtypeStruct((bb, N_CLASSES), jnp.float32)),
        in_specs=[pl.BlockSpec(memory_space=VMEM)] * 6,
        out_specs=(pl.BlockSpec(memory_space=VMEM),
                   pl.BlockSpec(memory_space=VMEM)),
    )(x, basis,
      params["fc1_w"], params["fc1_b"].reshape(1, -1),
      params["fc2_w"], params["fc2_b"].reshape(1, -1))
    # metadata-only reshape: (B, D) -> (B, 1, F, T), same element order as torch .view
    s = s_flat.reshape(bb, 1, F_BINS, T_BINS)
    return logits, s


# ---------------- pure-JAX reference (sanity check) ----------------
def mlpnet_reference(x, params):
    hi = jax.lax.Precision.HIGHEST
    lam = jnp.abs(params["lambd"])
    n = jnp.arange(N_POINTS, dtype=jnp.float32)
    t = jnp.arange(T_BINS, dtype=jnp.float32) * float(HOP)
    f = jnp.arange(F_BINS, dtype=jnp.float32)
    g = jnp.exp(-0.5 * jnp.square((n[None, :] - t[:, None]) / lam))          # (T, N)
    ang = 2.0 * jnp.pi * n[:, None] * f[None, :] / float(N_POINTS)           # (N, F)
    xc = x - jnp.mean(x, axis=1, keepdims=True)
    windowed = xc[:, None, :] * g[None, :, :]                                # (B, T, N)
    real = jnp.einsum("btn,nf->btf", windowed, jnp.cos(ang), precision=hi)
    imag = jnp.einsum("btn,nf->btf", windowed, jnp.sin(ang), precision=hi)
    s = jnp.transpose(real * real + imag * imag, (0, 2, 1))[:, None]         # (B,1,F,T)
    flat = s.reshape(s.shape[0], -1)
    h = jax.nn.relu(jnp.dot(flat, params["fc1_w"].T, precision=hi) + params["fc1_b"])
    logits = jnp.dot(h, params["fc2_w"].T, precision=hi) + params["fc2_b"]
    return logits, s


# ---------------- deterministic parameter init (PyTorch-style uniform) ----------------
def init_params(key):
    ks = jax.random.split(key, 4)

    def u(k, shape, fan_in):
        bound = 1.0 / math.sqrt(fan_in)
        return jax.random.uniform(k, shape, jnp.float32, -bound, bound)

    return {
        "lambd": jnp.float32(3.0),                               # init_lambd
        "fc1_w": u(ks[0], (HIDDEN, D_IN), D_IN),                 # (out, in) like torch
        "fc1_b": u(ks[1], (HIDDEN,), D_IN),
        "fc2_w": u(ks[2], (N_CLASSES, HIDDEN), HIDDEN),
        "fc2_b": u(ks[3], (N_CLASSES,), HIDDEN),
    }


if __name__ == "__main__":
    key = jax.random.PRNGKey(0)
    kx, kp = jax.random.split(key)
    x = jax.random.normal(kx, (B, N_POINTS), jnp.float32)
    params = init_params(kp)

    logits, s = jax.jit(mlpnet_forward)(x, params)
    jax.block_until_ready((logits, s))

    assert logits.shape == (B, N_CLASSES), logits.shape
    assert s.shape == (B, 1, F_BINS, T_BINS), s.shape

    ref_logits, ref_s = mlpnet_reference(x, params)
    assert jnp.allclose(s, ref_s, rtol=1e-2, atol=1e-2), "spectrogram mismatch"
    assert jnp.allclose(logits, ref_logits, rtol=1e-2, atol=1e-2), "logits mismatch"

    print("KERNEL_OK")
</pallas_src>

<mosaic_0001>
module attributes {stable_mosaic.version = 11 : i64} {
  func.func @mlpnet_kernel(%arg0: memref<2x15xf32, #tpu.memory_space<vmem>>, %arg1: memref<15x512xf32, #tpu.memory_space<vmem>>, %arg2: memref<128x256xf32, #tpu.memory_space<vmem>>, %arg3: memref<1x128xf32, #tpu.memory_space<vmem>>, %arg4: memref<10x128xf32, #tpu.memory_space<vmem>>, %arg5: memref<1x10xf32, #tpu.memory_space<vmem>>, %arg6: memref<2x256xf32, #tpu.memory_space<vmem>>, %arg7: memref<2x10xf32, #tpu.memory_space<vmem>>) attributes {dimension_semantics = [], scalar_prefetch = 0 : i64, scratch_operands = 0 : i64, tpu.core_type = #tpu.core_type<tc>} {
    %c0 = arith.constant 0 : index
    %c0_0 = arith.constant 0 : index
    %0 = vector.load %arg0[%c0, %c0_0] : memref<2x15xf32, #tpu.memory_space<vmem>>, vector<2x15xf32>
    %c0_1 = arith.constant 0 : index
    %c0_2 = arith.constant 0 : index
    %1 = vector.load %arg1[%c0_1, %c0_2] : memref<15x512xf32, #tpu.memory_space<vmem>>, vector<15x512xf32>
    %cst = arith.constant dense<0.000000e+00> : vector<2x512xf32>
    %2 = tpu.matmul %0, %1, %cst {dimension_numbers = #tpu.dot_dimension_numbers<[1], [0], [0], [1], [0, 0, 1, 1], [], []>} : vector<2x15xf32>, vector<15x512xf32>, vector<2x512xf32> -> vector<2x512xf32>
    %3 = vector.extract_strided_slice %2 {offsets = [0, 0], sizes = [2, 256], strides = [1, 1]} : vector<2x512xf32> to vector<2x256xf32>
    %4 = vector.extract_strided_slice %2 {offsets = [0, 256], sizes = [2, 256], strides = [1, 1]} : vector<2x512xf32> to vector<2x256xf32>
    %5 = arith.mulf %3, %3 : vector<2x256xf32>
    %6 = arith.mulf %4, %4 : vector<2x256xf32>
    %7 = arith.addf %5, %6 : vector<2x256xf32>
    %c0_3 = arith.constant 0 : index
    %c0_4 = arith.constant 0 : index
    %8 = vector.load %arg6[%c0_3, %c0_4] : memref<2x256xf32, #tpu.memory_space<vmem>>, vector<2x256xf32>
    tpu.vector_store %arg6[%c0_3, %c0_4], %7 {strides = array<i32>} : memref<2x256xf32, #tpu.memory_space<vmem>>, vector<2x256xf32>,
    %c0_5 = arith.constant 0 : index
    %c0_6 = arith.constant 0 : index
    %9 = vector.load %arg2[%c0_5, %c0_6] : memref<128x256xf32, #tpu.memory_space<vmem>>, vector<128x256xf32>
    %cst_7 = arith.constant dense<0.000000e+00> : vector<2x128xf32>
    %10 = tpu.matmul %7, %9, %cst_7 {dimension_numbers = #tpu.dot_dimension_numbers<[1], [1], [0], [0], [0, 0, 1, 0], [], []>} : vector<2x256xf32>, vector<128x256xf32>, vector<2x128xf32> -> vector<2x128xf32>
    %c0_8 = arith.constant 0 : index
    %c0_9 = arith.constant 0 : index
    %11 = vector.load %arg3[%c0_8, %c0_9] : memref<1x128xf32, #tpu.memory_space<vmem>>, vector<1x128xf32>
    %12 = vector.broadcast %11 : vector<1x128xf32> to vector<2x128xf32>
    %13 = arith.addf %10, %12 : vector<2x128xf32>
    %cst_10 = arith.constant 0.000000e+00 : f32
    %14 = vector.broadcast %cst_10 : f32 to vector<2x128xf32>
    %15 = arith.maximumf %13, %14 : vector<2x128xf32>
    %c0_11 = arith.constant 0 : index
    %c0_12 = arith.constant 0 : index
    %16 = vector.load %arg4[%c0_11, %c0_12] : memref<10x128xf32, #tpu.memory_space<vmem>>, vector<10x128xf32>
    %cst_13 = arith.constant dense<0.000000e+00> : vector<2x10xf32>
    %17 = tpu.matmul %15, %16, %cst_13 {dimension_numbers = #tpu.dot_dimension_numbers<[1], [1], [0], [0], [0, 0, 1, 0], [], []>} : vector<2x128xf32>, vector<10x128xf32>, vector<2x10xf32> -> vector<2x10xf32>
    %c0_14 = arith.constant 0 : index
    %c0_15 = arith.constant 0 : index
    %18 = vector.load %arg5[%c0_14, %c0_15] : memref<1x10xf32, #tpu.memory_space<vmem>>, vector<1x10xf32>
    %19 = vector.broadcast %18 : vector<1x10xf32> to vector<2x10xf32>
    %20 = arith.addf %17, %19 : vector<2x10xf32>
    %c0_16 = arith.constant 0 : index
    %c0_17 = arith.constant 0 : index
    %21 = vector.load %arg7[%c0_16, %c0_17] : memref<2x10xf32, #tpu.memory_space<vmem>>, vector<2x10xf32>
    tpu.vector_store %arg7[%c0_16, %c0_17], %20 {strides = array<i32>} : memref<2x10xf32, #tpu.memory_space<vmem>>, vector<2x10xf32>,
    return
  }
}

</mosaic_0001>

<bundles_post_ra>
// kernel: mlpnet_forward.1
= control target key start
LH: loop header
LB: loop body
LE: loop exit
PB: predicated region body
PF: predicated region fallthrough
CT: control target
= control target key end

     0   :  { %vm39_vm0 = vcmask 1046528   ;;  %vm516_vm1 = vmmov 1   ;;  %v517_v7 = vmov 0.0   ;;  %vm35_vm3 = vcmask 121856   ;;  %s728_s0 = inlined_call_operand.vmem [shape: f32[2,15], index: 0, kind: input, shape index: {}]   ;;  %s729_s1 = inlined_call_operand.vmem [shape: f32[15,512], index: 1, kind: input, shape index: {}]   ;;  %s730_s2 = inlined_call_operand.vmem [shape: f32[128,256], index: 2, kind: input, shape index: {}]   ;;  %s731_s3 = inlined_call_operand.vmem [shape: f32[1,128], index: 3, kind: input, shape index: {}]   ;;  %s732_s4 = inlined_call_operand.vmem [shape: f32[10,128], index: 4, kind: input, shape index: {}]   ;;  %s733_s5 = inlined_call_operand.vmem [shape: f32[1,10], index: 5, kind: input, shape index: {}]   ;;  %s734_s6 = inlined_call_operand.vmem [shape: f32[2,256], index: 6, kind: output, shape index: {0}]   ;;  %s735_s7 = inlined_call_operand.hbm [shape: f32[2,10], index: 7, kind: output, shape index: {1}]  }
   0x1   :  { %v28_v0 = vld [vmem:[%s729_s1 + $0x8] sm:$0xff]  ;;  %v27_v2 = vld [vmem:[%s729_s1] sm:$0xff]  ;;  %vm570_vm2 = vmpackc.low %vm39_vm0, %vm516_vm1  ;;  %116 = vmatprep.mubr.f32.mxu1 %v517_v7 }
   0x2   :  { %v32_v1 = vld [vmem:[%s729_s1 + $0x28] sm:$0x7f]  ;;  %v31_v5 = vld [vmem:[%s729_s1 + $0x20] sm:$0x7f]  ;;  %v30_v9 = vld [vmem:[%s729_s1 + $0x18] sm:$0xff] }
   0x3   :  { %v440_v3 = vpack.c.bf16 %v32_v1, %v28_v0  ;;  %v443_v6 = vpack.c.bf16 %v31_v5, %v27_v2  ;;  %v26_v8 = vld [vmem:[%s728_s0] sm:$0x3]  ;;  %v34_v10 = vld [vmem:[%s729_s1 + $0x38] sm:$0x7f]  ;;  %v29_v11 = vld [vmem:[%s729_s1 + $0x10] sm:$0xff] }
   0x4   :  { %v446_v12 = vpack.c.bf16 %v34_v10, %v30_v9  ;;  %v33_v13 = vld [vmem:[%s729_s1 + $0x30] sm:$0x7f]  ;;  %v213_v14 = vld [vmem:[%s730_s2 + $0x8] sm:$0xff]  ;;  %v215_v15 = vld [vmem:[%s730_s2 + $0x18] sm:$0xff] }
   0x5   :  { %442 = vmatprep.subr.msk.bf16.mxu1 %vm570_vm2, %v440_v3  ;;  %v449_v16 = vpack.c.bf16 %v33_v13, %v29_v11  ;;  %v452_v17 = vpack.c.bf16 %v215_v15, %v213_v14  ;;  %v212_v18 = vld [vmem:[%s730_s2] sm:$0xff]  ;;  %v214_v19 = vld [vmem:[%s730_s2 + $0x10] sm:$0xff]  ;;  %v217_v20 = vld [vmem:[%s730_s2 + $0x28] sm:$0xff] }
   0x6   :  { %445 = vmatpush1.bf16.msk.msra.mxu1 %vm570_vm2, %v443_v6  ;;  %v454_v21 = vpack.c.bf16 %v214_v19, %v212_v18  ;;  %v219_v22 = vld [vmem:[%s730_s2 + $0x38] sm:$0xff]  ;;  %v216_v24 = vld [vmem:[%s730_s2 + $0x20] sm:$0xff]  ;;  %v218_v25 = vld [vmem:[%s730_s2 + $0x30] sm:$0xff] }
   0x7   :  { %448 = vmatprep.subr.msk.bf16.mxu1 %vm570_vm2, %v446_v12  ;;  %453 = vmatprep.subr.bf16.mxu0 %v452_v17  ;;  %v456_v23 = vpack.c.bf16 %v219_v22, %v217_v20  ;;  %v221_v26 = vld [vmem:[%s730_s2 + $0x48] sm:$0xff]  ;;  %v223_v27 = vld [vmem:[%s730_s2 + $0x58] sm:$0xff]  ;;  %v458_v28 = vpack.c.bf16 %v218_v25, %v216_v24 }
   0x8   :  { %455 = vmatpush1.bf16.xpose.msra.mxu0 %v454_v21  ;;  %v460_v29 = vpack.c.bf16 %v223_v27, %v221_v26 }
   0x9   :  { %423 = vmatmul.mubr.msk.f32.vlgmr.msra.gmra.mrb[0].mxu1 %vm35_vm3, %v26_v8  ;;  %457 = vmatprep.subr.bf16.mxu0 %v456_v23 }
   0xa   :  { %451 = vmatpush1.bf16.msk.msra.mxu1 %vm570_vm2, %v449_v16  ;;  %187 = vmatprep.mubr.f32.mxu1 %v517_v7 }
   0xd   :  { %426 = vmatmul.mubr.msk.f32.vlgmr.msra.gmra.mrb[2].mxu1 %vm35_vm3, %v26_v8 }
   0xe   :  { %13 = vsyncpa [#allocation3], 0  ;;  %v220_v30 = vld [vmem:[%s730_s2 + $0x40] sm:$0xff]  ;;  %v222_v31 = vld [vmem:[%s730_s2 + $0x50] sm:$0xff]  ;;  %v518_v1 = vmov 0.0|0.0   ;;  %vm519_vm4 = vmmov 0  }
   0xf   :  { %v225_v32 = vld [vmem:[%s730_s2 + $0x68] sm:$0xff]  ;;  %v227_v33 = vld [vmem:[%s730_s2 + $0x78] sm:$0xff]  ;;  %v462_v34 = vpack.c.bf16 %v222_v31, %v220_v30  ;;  %v224_v36 = vld [vmem:[%s730_s2 + $0x60] sm:$0xff]  ;;  %484 = vmatprep.subr.bf16.mxu1 %v518_v1  ;;  %437 = vmatprep.mubr.msk.f32.mxu1 %vm519_vm4, %v517_v7  ;;  %s520_s16 = smov [#allocation2]   ;;  %vm401_vm5 = vcmask 74752  }
  0x10   :  { %459 = vmatpush1.bf16.xpose.msra.mxu0 %v458_v28  ;;  %v464_v35 = vpack.c.bf16 %v227_v33, %v225_v32  ;;  %v226_v37 = vld [vmem:[%s730_s2 + $0x70] sm:$0xff]  ;;  %v229_v38 = vld [vmem:[%s730_s2 + $0x88] sm:$0xff]  ;;  %v231_v39 = vld [vmem:[%s730_s2 + $0x98] sm:$0xff]  ;;  %s411_s17 = sshll.u32 %s520_s16, 4  ;;  %s412_s17 = int_to_ptr.vmem [resolvable:$true] %s411_s17 }
  0x11   :  { %461 = vmatprep.subr.bf16.mxu0 %v460_v29  ;;  %v466_v40 = vpack.c.bf16 %v226_v37, %v224_v36  ;;  %v468_v41 = vpack.c.bf16 %v231_v39, %v229_v38  ;;  %v228_v42 = vld [vmem:[%s730_s2 + $0x80] sm:$0xff]  ;;  %v230_v43 = vld [vmem:[%s730_s2 + $0x90] sm:$0xff]  ;;  %v233_v44 = vld [vmem:[%s730_s2 + $0xa8] sm:$0xff]  ;;  %p497_p1 = scmp.lt.s32.totalorder %s412_s17, %s412_s17 }
  0x12   :  { %v235_v45 = vld [vmem:[%s730_s2 + $0xb8] sm:$0xff]  ;;  %v470_v46 = vpack.c.bf16 %v230_v43, %v228_v42  ;;  %v232_v48 = vld [vmem:[%s730_s2 + $0xa0] sm:$0xff]  ;;  %v234_v49 = vld [vmem:[%s730_s2 + $0xb0] sm:$0xff] }
  0x13   :  { %v472_v47 = vpack.c.bf16 %v235_v45, %v233_v44  ;;  %v237_v50 = vld [vmem:[%s730_s2 + $0xc8] sm:$0xff]  ;;  %v239_v51 = vld [vmem:[%s730_s2 + $0xd8] sm:$0xff]  ;;  %v474_v52 = vpack.c.bf16 %v234_v49, %v232_v48  ;;  %v236_v54 = vld [vmem:[%s730_s2 + $0xc0] sm:$0xff] }
  0x14   :  { %v476_v53 = vpack.c.bf16 %v239_v51, %v237_v50  ;;  %v238_v55 = vld [vmem:[%s730_s2 + $0xd0] sm:$0xff]  ;;  %v241_v57 = vld [vmem:[%s730_s2 + $0xe8] sm:$0xff]  ;;  %v243_v58 = vld [vmem:[%s730_s2 + $0xf8] sm:$0xff] }
  0x15   :  { %v478_v56 = vpack.c.bf16 %v238_v55, %v236_v54  ;;  %v480_v59 = vpack.c.bf16 %v243_v58, %v241_v57  ;;  %v240_v60 = vld [vmem:[%s730_s2 + $0xe0] sm:$0xff]  ;;  %v242_v61 = vld [vmem:[%s730_s2 + $0xf0] sm:$0xff]  ;;  %v323_v0 = vld [vmem:[%s732_s4 + $0x8] sm:$0x3] }
  0x16   :  { %v482_v62 = vpack.c.bf16 %v242_v61, %v240_v60  ;;  %v322_v63 = vld [vmem:[%s732_s4] sm:$0xff] }
  0x17   :  { %v485_v2 = vpack.c.bf16 %v323_v0, %v322_v63  ;;  %v428_v15 = vld [vmem:[%s731_s3] ss:$0 sm:$0xff] }
  0x18   :  { %463 = vmatpush1.bf16.xpose.msra.mxu0 %v462_v34  ;;  %v429_v20 = vld [vmem:[%s733_s5] ss:$0 sm:$0xff] }
  0x19   :  { %465 = vmatprep.subr.bf16.mxu0 %v464_v35  ;;  %486 = vmatpush3.bf16.xpose.msra.mxu1 %v485_v2 }
  0x20   :  { %467 = vmatpush1.bf16.xpose.msra.mxu0 %v466_v40 }
  0x21   :  { %469 = vmatprep.subr.bf16.mxu0 %v468_v41 }
  0x28   :  { %471 = vmatpush1.bf16.xpose.msra.mxu0 %v470_v46 }
  0x29   :  { %473 = vmatprep.subr.bf16.mxu0 %v472_v47 }
  0x30   :  { %475 = vmatpush1.bf16.xpose.msra.mxu0 %v474_v52 }
  0x31   :  { %477 = vmatprep.subr.bf16.mxu0 %v476_v53 }
  0x38   :  { %479 = vmatpush1.bf16.xpose.msra.mxu0 %v478_v56 }
  0x39   :  { %481 = vmatprep.subr.bf16.mxu0 %v480_v59 }
  0x40   :  { %483 = vmatpush1.bf16.xpose.msra.mxu0 %v482_v62 }
  0xdc   :  { %v118_v3 = vpop.f32.mrb[0].mxu1 }
  0xdd   :  { %v120_v4 = vpop.f32.mrb[1].mxu1  ;;  %v194_v6 = vmul.f32 %v118_v3, %v118_v3 }
  0xde   :  { %v195_v10 = vmul.f32 %v120_v4, %v120_v4 }
  0xe0   :  { %v189_v5 = vpop.f32.mrb[2].mxu1 }
  0xe1   :  { %v196_v8 = vmul.f32 %v189_v5, %v189_v5  ;;  %v191_v9 = vpop.f32.mrb[3].mxu1 }
  0xe2   :  { %v197_v11 = vmul.f32 %v191_v9, %v191_v9 }
  0xe3   :  { %v198_v12 = vadd.f32 %v196_v8, %v194_v6 }
  0xe4   :  { %v199_v13 = vadd.f32 %v197_v11, %v195_v10 }
  0xe6   :  { %v202_v14 = vcombine.low %v198_v12, %v199_v13  ;;  %315 = vmatprep.mubr.f32.mxu0 %v199_v13 }
  0xe7   :  { %316 = vmatmul.mubr.f32.vlgmr.msra.gmra.mrb[0].mxu0 %v198_v12 }
  0xe8   :  { %427 = vst.sshfl [vmem:[%s734_s6] sm:$0x33 pattern:$0x76325410] %v202_v14  ;;  %s492_s6 = scalar_lea.vmem %s412_s17, 32 }
  0xe9   :  { %p493_p0 = scmp.ne.s32.totalorder %s412_s17, %s492_s6  ;;  %p498_p2 = scmp.lt.s32.totalorder %s492_s6, %s492_s6 }
  0xeb   :  { %p499_p3 = por %p498_p2, %p497_p1 }
  0xed   :  { %p500_p4 = pnand %p499_p3, %p493_p0 }
 0x1ba   :  { %v317_v16 = vpop.f32.mrb[0].mxu0 }
 0x1bb   :  { %v318_v17 = vadd.f32 %v428_v15, %v317_v16  ;;  %v319_v18 = vpop.f32.mrb[1].mxu0 }
 0x1bd   :  { %v321_v19 = vmax.f32 %v318_v17, 0.0 }
 0x1bf   :  { %438 = vmatmul.mubr.f32.vlgmr.msra.gmra.mrb[4].mxu1 %v321_v19 }
 0x292   :  { %v397_v21 = vpop.f32.mrb[4].mxu1 }
 0x293   :  { %v398_v22 = vadd.f32 %v429_v20, %v397_v21  ;;  %v439_v23 = vpop.f32.mrb[5].mxu1 }
 0x295   :  { %402 = vst.msk [vmem:[#allocation2] sm:$0x3] %vm401_vm5, %v398_v22 }
 0x296   :  { %503 = shalt.err (!%p500_p4)
}
 0x297   :  { %s504_s0 = scalar_lea.hbm %s735_s7, 32 }
 0x298   :  { %p505_p5 = scmp.ne.s32.totalorder %s735_s7, %s504_s0  ;;  %p508_p6 = scmp.lt.u32.totalorder %s504_s0, %s735_s7 }
 0x29a   :  { %p510_p7 = pnand %p508_p6, %p505_p5 }
 0x29c   :  { %513 = shalt.err (!%p510_p7)
}
 0x29d   :  { %414 = dma.vmem_to_hbm [thread:$0]  %s412_s17, 32, %s735_s7, [#allocation3]  }
 0x29e   :  { %514 = dma.done.wait [#allocation3], 32  }
 0x29f   :  { %515 = vsyncadd [#allocation3], 4294967264 }
 0x2a0   :  { %420 = vsyncpa [#allocation3], 1 }

</bundles_post_ra>
